<compile_context>
chip_gen: v6e
topology: v6e:2x2x1
jax: 0.10.0
libtpu: 0.0.40
codegen_flags: <defaults>
</compile_context>

<pallas_src>
import jax
import jax.numpy as jnp
from jax.experimental import pallas as pl
from jax.experimental.pallas import tpu as pltpu


def _dot_predictor_kernel(xi_ref, xj_ref, o_ref):
    # Row-wise dot product of the (TILE_N, D) blocks, accumulated in f32.
    # The kernel is HBM-bandwidth bound, so the upcast + VALU multiply +
    # cross-lane reduce all hide under the input DMA.
    xi = xi_ref[...].astype(jnp.float32)
    xj = xj_ref[...].astype(jnp.float32)
    s = jnp.sum(xi * xj, axis=-1)  # (TILE_N,)
    # Lane-dense store: output block is (1, TILE_N) -> full-width unmasked vst
    # for TILE_N that is a multiple of 128.
    # TODO(synk): if a bundle dump ever shows the sublane->lane relayout of `s`
    # binding at very small D, emit (TILE_N, 128) lane-partial sums here and
    # finish the 128->1 reduce in the wrapper instead.
    o_ref[...] = s.reshape(1, -1).astype(o_ref.dtype)


def _round_up(x: int, m: int) -> int:
    return (x + m - 1) // m * m


def _vmem_plan():
    """Per-generation (input-buffer budget, scoped-vmem limit) in bytes."""
    try:
        cap = int(pltpu.get_tpu_info().vmem_capacity_bytes)
    except Exception:
        cap = None
    if cap is not None and cap > (64 << 20):
        # v5e / v6e: 128 MiB physical VMEM. Raise the scoped limit well above
        # the 16/32 MiB defaults and spend it on bigger row tiles.
        return 48 << 20, 96 << 20
    # v7x (64 MiB per TensorCore) or unknown hardware: stay conservative so
    # 4 input double-buffers + output buffers + Mosaic scratch fit comfortably.
    return 32 << 20, 48 << 20


def _choose_tile_n(N: int, D: int, itemsize: int, vmem_budget: int) -> int:
    """Pick the row-tile size.

    VMEM accounting uses the lane-padded width (round_up(D, 128)) and the
    dtype sublane tile (8 rows f32 / 16 rows bf16), covering 2 inputs x 2
    pipeline buffers plus the (1, TILE_N) output double buffer.
    """
    sublane = 32 if itemsize == 1 else (16 if itemsize == 2 else 8)
    if N < 128:
        # Single whole-array block: block dims == full array dims is always
        # layout-legal, and there is nothing worth pipelining at this size.
        return N
    d_lanes = _round_up(D, 128)
    bytes_per_row = 4 * d_lanes * itemsize + 2 * itemsize
    max_rows = max(sublane, vmem_budget // bytes_per_row)
    # Aim for >= 4 grid steps (pipeline overlap + v7x 2-TensorCore sharding),
    # with a 128-row floor to keep output stores lane-dense and amortize the
    # ~0.35us per-grid-step overhead. Cap at 1024 rows (~85-86% of the HBM
    # roofline in measured tiled-copy data; larger tiles add nothing).
    multi_step_cap = max(128, _round_up(pl.cdiv(N, 4), 128))
    tile = min(1024, max_rows, multi_step_cap, _round_up(N, 128))
    if tile >= 128:
        tile -= tile % 128
    else:
        # Extremely large D forced a sub-128 row tile.
        # TODO(synk): add a second "arbitrary" reduction grid axis over D with
        # a VMEM accumulator instead of shrinking TILE_N below 128.
        tile -= tile % sublane
    return max(tile, sublane)


def dot_predictor(x_i: jax.Array, x_j: jax.Array) -> jax.Array:
    """Pallas TPU implementation of DotPredictor.forward.

    x_i, x_j: (N, D) arrays. Returns (N,) array of row-wise dot products.
    """
    assert x_i.shape == x_j.shape and x_i.ndim == 2
    N, D = x_i.shape
    itemsize = jnp.dtype(x_i.dtype).itemsize
    in_budget, vmem_limit = _vmem_plan()
    tile = _choose_tile_n(N, D, itemsize, in_budget)
    num_tiles = pl.cdiv(N, tile)

    # No input padding: when N % tile != 0 the final input block reads
    # unspecified rows past N, but the reduce is strictly per-row so those
    # values only reach output rows >= N, which the trailing [:N] slice drops.
    out = pl.pallas_call(
        _dot_predictor_kernel,
        out_shape=jax.ShapeDtypeStruct((num_tiles, tile), x_i.dtype),
        grid=(num_tiles,),
        in_specs=[
            pl.BlockSpec((tile, D), lambda i: (i, 0)),
            pl.BlockSpec((tile, D), lambda i: (i, 0)),
        ],
        out_specs=pl.BlockSpec((1, tile), lambda i: (i, 0)),
        compiler_params=pltpu.CompilerParams(
            dimension_semantics=("parallel",),
            vmem_limit_bytes=vmem_limit,
        ),
    )(x_i, x_j)
    # Lane-dense (num_tiles, TILE_N) -> flat (N,); the reshape is copy-free and
    # the slice only trims rows >= N (no-op when N % tile == 0).
    return out.reshape(-1)[:N]


if __name__ == "__main__":
    # DotPredictor.__init__ creates no parameters, so nothing to initialize.
    key = jax.random.PRNGKey(0)
    k1, k2, k3, k4 = jax.random.split(key, 4)

    # Primary small-shape check (seq=8, hidden=32).
    N, D = 8, 32
    x_i = jax.random.normal(k1, (N, D), dtype=jnp.float32)
    x_j = jax.random.normal(k2, (N, D), dtype=jnp.float32)
    y = dot_predictor(x_i, x_j)
    jax.block_until_ready(y)
    y_ref = jnp.sum(x_i * x_j, axis=-1)
    assert y.shape == (N,)
    assert jnp.allclose(y, y_ref, atol=1e-5, rtol=1e-5)

    # Ragged multi-tile path (N % TILE_N != 0): exercises the un-padded final
    # block handling and the multi-step grid.
    N2, D2 = 300, 96
    a = jax.random.normal(k3, (N2, D2), dtype=jnp.float32)
    b = jax.random.normal(k4, (N2, D2), dtype=jnp.float32)
    y2 = dot_predictor(a, b)
    jax.block_until_ready(y2)
    y2_ref = jnp.sum(a * b, axis=-1)
    assert y2.shape == (N2,)
    assert jnp.allclose(y2, y2_ref, atol=1e-4, rtol=1e-4)

    print("KERNEL_OK")
</pallas_src>

<mosaic_0001>
module attributes {stable_mosaic.version = 11 : i64} {
  func.func @_dot_predictor_kernel(%arg0: i32, %arg1: memref<8x32xf32, #tpu.memory_space<vmem>>, %arg2: memref<8x32xf32, #tpu.memory_space<vmem>>, %arg3: memref<1x8xf32, #tpu.memory_space<vmem>>) attributes {dimension_semantics = [#tpu.dimension_semantics<parallel>], iteration_bounds = array<i64: 1>, scalar_prefetch = 0 : i64, scratch_operands = 0 : i64, tpu.core_type = #tpu.core_type<tc>, window_params = [{transform_indices = @transform_0, window_bounds = array<i64: 8, 32>}, {transform_indices = @transform_1, window_bounds = array<i64: 8, 32>}, {transform_indices = @transform_2, window_bounds = array<i64: 1, 8>}]} {
    %c0 = arith.constant 0 : index
    %c0_0 = arith.constant 0 : index
    %0 = vector.load %arg1[%c0, %c0_0] : memref<8x32xf32, #tpu.memory_space<vmem>>, vector<8x32xf32>
    %c0_1 = arith.constant 0 : index
    %c0_2 = arith.constant 0 : index
    %1 = vector.load %arg2[%c0_1, %c0_2] : memref<8x32xf32, #tpu.memory_space<vmem>>, vector<8x32xf32>
    %2 = arith.mulf %0, %1 : vector<8x32xf32>
    %cst = arith.constant dense<0.000000e+00> : vector<8xf32>
    %3 = vector.multi_reduction <add>, %2, %cst [1] : vector<8x32xf32> to vector<8xf32>
    %4 = vector.shape_cast %3 : vector<8xf32> to vector<1x8xf32>
    %c0_3 = arith.constant 0 : index
    %c0_4 = arith.constant 0 : index
    %5 = vector.load %arg3[%c0_3, %c0_4] : memref<1x8xf32, #tpu.memory_space<vmem>>, vector<1x8xf32>
    tpu.vector_store %arg3[%c0_3, %c0_4], %4 {strides = array<i32>} : memref<1x8xf32, #tpu.memory_space<vmem>>, vector<1x8xf32>,
    return
  }
  func.func @transform_0(%arg0: i32) -> (i32, i32) {
    %c0_i32 = arith.constant 0 : i32
    %c0_i32_0 = arith.constant 0 : i32
    return %arg0, %c0_i32 : i32, i32
  }
  func.func @transform_1(%arg0: i32) -> (i32, i32) {
    %c0_i32 = arith.constant 0 : i32
    %c0_i32_0 = arith.constant 0 : i32
    return %arg0, %c0_i32 : i32, i32
  }
  func.func @transform_2(%arg0: i32) -> (i32, i32) {
    %c0_i32 = arith.constant 0 : i32
    %c0_i32_0 = arith.constant 0 : i32
    return %arg0, %c0_i32 : i32, i32
  }
}

</mosaic_0001>

<bundles_post_ra>
// kernel: tpu_custom_call.1
= control target key start
LH: loop header
LB: loop body
LE: loop exit
PB: predicated region body
PF: predicated region fallthrough
CT: control target
= control target key end

     0   :  { %7 = vsyncpa [#allocation3], 0  ;;  %s165_s0 = inlined_call_operand.hbm [shape: f32[8,32], index: 0, kind: input, shape index: {}]   ;;  %s166_s1 = inlined_call_operand.hbm [shape: f32[8,32], index: 1, kind: input, shape index: {}]   ;;  %s167_s2 = inlined_call_operand.hbm [shape: f32[1,8], index: 2, kind: output, shape index: {}]  }
   0x1   :  { %8 = vsyncpa [#allocation6], 0 }
   0x2   :  { %9 = vsyncpa [#allocation4], 0  ;;  %s138_s9 = smov [#allocation2]   ;;  %s139_s11 = smov [#allocation5]  }
   0x3   :  { %s16_s10 = sshll.u32 %s138_s9, 4  ;;  %s26_s12 = sshll.u32 %s139_s11, 4  ;;  %s17_s10 = int_to_ptr.vmem [resolvable:$true] %s16_s10  ;;  %s27_s12 = int_to_ptr.vmem [resolvable:$true] %s26_s12 }
   0x4   :  { %s80_s13 = scalar_lea.vmem %s17_s10, 128  ;;  %p85_p1 = scmp.lt.s32.totalorder %s17_s10, %s17_s10 }
   0x5   :  { %p81_p0 = scmp.ne.s32.totalorder %s17_s10, %s80_s13  ;;  %p86_p2 = scmp.lt.s32.totalorder %s80_s13, %s80_s13 }
   0x7   :  { %p87_p3 = por %p86_p2, %p85_p1 }
   0x9   :  { %p88_p4 = pnand %p87_p3, %p81_p0 }
   0xb   :  { %91 = shalt.err (!%p88_p4)
}
   0xc   :  { %19 = dma.hbm_to_vmem [thread:$0]  %s165_s0, 128, %s17_s10, [#allocation3]  }
   0xd   :  { %s100_s16 = scalar_lea.vmem %s27_s12, 128  ;;  %p105_p6 = scmp.lt.s32.totalorder %s27_s12, %s27_s12 }
   0xe   :  { %p101_p5 = scmp.ne.s32.totalorder %s27_s12, %s100_s16  ;;  %p106_p7 = scmp.lt.s32.totalorder %s100_s16, %s100_s16 }
  0x10   :  { %p107_p8 = por %p106_p7, %p105_p6 }
  0x12   :  { %p108_p9 = pnand %p107_p8, %p101_p5 }
  0x14   :  { %111 = shalt.err (!%p108_p9)
}
  0x15   :  { %29 = dma.hbm_to_vmem [thread:$0]  %s166_s1, 128, %s27_s12, [#allocation6]  }
  0x16   :  { %132 = dma.done.wait [#allocation3], 128  }
  0x17   :  { %133 = vsyncadd [#allocation3], 4294967168 }
  0x18   :  { %134 = dma.done.wait [#allocation6], 128  }
  0x19   :  { %135 = vsyncadd [#allocation6], 4294967168  ;;  %v36_v0 = vld [vmem:[#allocation2] sm:$0xff]  ;;  %v37_v1 = vld [vmem:[#allocation5] sm:$0xff]  ;;  %vm39_vm0 = vcmask 261120   ;;  %v44_v4 = vlaneseq  ;;  %s140_s0 = smov [#allocation7]  }
  0x1a   :  { %v38_v2 = vmul.f32 %v37_v1, %v36_v0  ;;  %s59_s19 = sshll.u32 %s140_s0, 4  ;;  %vm51_vm1 = vcmask 57344   ;;  %s60_s19 = int_to_ptr.vmem [resolvable:$true] %s59_s19 }
  0x1b   :  { %v45_v5 = vand.u32 127, %v44_v4  ;;  %v47_v6 = vshrl.u32 %v44_v4, 7  ;;  %s112_s1 = scalar_lea.vmem %s60_s19, 16  ;;  %s116_s20 = scalar_lea.vmem %s60_s19, 32 }
  0x1c   :  { %v40_v3 = vsel %vm39_vm0, %v38_v2, 0.0  ;;  %p113_p10 = scmp.ne.s32.totalorder %s60_s19, %s112_s1  ;;  %p117_p11 = scmp.lt.s32.totalorder %s60_s19, %s60_s19 }
  0x1d   :  { %41 = vadd.xlane.f32.xlu0 %v40_v3  ;;  %v48_v7 = vsub.s32 %v45_v5, %v47_v6  ;;  %p118_p12 = scmp.lt.s32.totalorder %s116_s20, %s112_s1 }
  0x1f   :  { %p119_p13 = por %p118_p12, %p117_p11 }
  0x21   :  { %p120_p0 = pnand %p119_p13, %p113_p10 }
  0xa6   :  { %v42_v8 = vpop.xlane.xlu0 %41 }
  0xa7   :  { %v49_v9 = vrot.slane %v42_v8, %v48_v7 }
  0xa9   :  { %52 = vst.msk [vmem:[#allocation7] sm:$0x1] %vm51_vm1, %v49_v9 }
  0xaa   :  { %123 = shalt.err (!%p120_p0)
}
  0xab   :  { %62 = dma.vmem_to_hbm [thread:$0]  %s60_s19, 16, %s167_s2, [#allocation4]  }
  0xac   :  { %136 = dma.done.wait [#allocation4], 16  }
  0xad   :  { %137 = vsyncadd [#allocation4], 4294967280 }
  0xae   :  { %66 = vsyncpa [#allocation3], 1 }
  0xaf   :  { %67 = vsyncpa [#allocation6], 1 }
  0xb0   :  { %68 = vsyncpa [#allocation4], 1 }

</bundles_post_ra>
